<compile_context>
chip_gen: v7x
topology: tpu7x:2x2x1
jax: 0.10.0
libtpu: 0.0.40
codegen_flags: <defaults>
</compile_context>

<pallas_src>
import math
import jax
import jax.numpy as jnp
from jax.experimental import pallas as pl
from jax.experimental.pallas import tpu as pltpu

BN_EPS = 1e-5


def _round_up(v, m):
    return ((v + m - 1) // m) * m


def blend_linear_kernel(t_ref, x_ref, w_ref, b_ref, gamma_ref, beta_ref,
                        o_ref, acc_ref):
    k = pl.program_id(1)

    @pl.when(k == 0)
    def _():
        acc_ref[...] = jnp.zeros_like(acc_ref)

    # One wide MXU pass: [y0 | yd] = x @ [W0 | W1-W0]   (bf16 in, f32 acc).
    acc_ref[...] += jnp.dot(x_ref[...], w_ref[...],
                            preferred_element_type=jnp.float32)

    @pl.when(k == pl.num_programs(1) - 1)
    def _():
        tn = o_ref.shape[1]
        ycat = acc_ref[...] + b_ref[...]          # biases added once, in f32
        y0 = ycat[:, :tn]
        yd = ycat[:, tn:]
        t = t_ref[...]                            # (B, 1) broadcasts over lanes
        out = y0 + yd * t                         # == y0 + (y1 - y0) * t[:,None]

        # BatchNorm1d (training mode): biased stats over the full batch axis.
        mean = jnp.mean(out, axis=0, keepdims=True)
        var = jnp.mean((out - mean) * (out - mean), axis=0, keepdims=True)
        inv_std = jax.lax.rsqrt(var + BN_EPS)
        o_ref[...] = ((out - mean) * inv_std * gamma_ref[...]
                      + beta_ref[...]).astype(o_ref.dtype)


def blend_linear(t, x, w0, b0, w1, b1, gamma, beta, *, tn=128, tk=512):
    B, din = x.shape
    dout = w0.shape[1]

    # Lane-dense tiling: pad feature dims up to multiples of 128.
    tn = min(tn, _round_up(dout, 128))
    tk = min(tk, _round_up(din, 128))
    dout_p = _round_up(dout, tn)
    din_p = _round_up(din, tk)
    n_j = dout_p // tn      # Dout tiles  (parallel — megacore-shardable)
    n_k = din_p // tk       # K tiles     (reduction, innermost / arbitrary)

    pad_k = din_p - din
    pad_n = dout_p - dout

    # Hoisted blend algebra: Wd = W1 - W0, bd = b1 - b0.
    wd = w1 - w0
    bd = b1 - b0
    w0_p = jnp.pad(w0, ((0, pad_k), (0, pad_n)))
    wd_p = jnp.pad(wd, ((0, pad_k), (0, pad_n)))
    b0_p = jnp.pad(b0, (0, pad_n))
    bd_p = jnp.pad(bd, (0, pad_n))
    gamma_p = jnp.pad(gamma, (0, pad_n)).reshape(1, dout_p).astype(jnp.float32)
    beta_p = jnp.pad(beta, (0, pad_n)).reshape(1, dout_p).astype(jnp.float32)
    x_p = jnp.pad(x, ((0, 0), (0, pad_k)))

    # Interleave per Dout tile: [... | W0 tile j | Wd tile j | ...] so a single
    # contiguous (tk, 2*tn) block feeds one wide MXU matmul per grid step.
    w_cat = jnp.concatenate(
        [w0_p.reshape(din_p, n_j, 1, tn), wd_p.reshape(din_p, n_j, 1, tn)],
        axis=2).reshape(din_p, n_j * 2 * tn)
    b_cat = jnp.concatenate(
        [b0_p.reshape(1, n_j, 1, tn), bd_p.reshape(1, n_j, 1, tn)],
        axis=2).reshape(1, n_j * 2 * tn).astype(jnp.float32)

    # bf16 matmul operands (MXU-native on v6e/v7x); epilogue stays f32.
    x_bf = x_p.astype(jnp.bfloat16)
    w_bf = w_cat.astype(jnp.bfloat16)
    t2 = t.reshape(B, 1).astype(jnp.float32)

    out = pl.pallas_call(
        blend_linear_kernel,
        out_shape=jax.ShapeDtypeStruct((B, dout_p), jnp.float32),
        grid_spec=pltpu.PrefetchScalarGridSpec(
            num_scalar_prefetch=0,
            grid=(n_j, n_k),
            in_specs=[
                pl.BlockSpec((B, 1), lambda j, k: (0, 0)),        # t
                pl.BlockSpec((B, tk), lambda j, k: (0, k)),       # x
                pl.BlockSpec((tk, 2 * tn), lambda j, k: (k, j)),  # [W0 | Wd]
                pl.BlockSpec((1, 2 * tn), lambda j, k: (0, j)),   # [b0 | bd]
                pl.BlockSpec((1, tn), lambda j, k: (0, j)),       # gamma
                pl.BlockSpec((1, tn), lambda j, k: (0, j)),       # beta
            ],
            out_specs=pl.BlockSpec((B, tn), lambda j, k: (0, j)),
            scratch_shapes=[pltpu.VMEM((B, 2 * tn), jnp.float32)],
        ),
        compiler_params=pltpu.CompilerParams(
            dimension_semantics=("parallel", "arbitrary")),
    )(t2, x_bf, w_bf, b_cat, gamma_p, beta_p)

    return out[:, :dout]


def init_linear_params(key, dim_in, dim_out):
    """Deterministic init mimicking nn.Linear's kaiming-uniform defaults."""
    kw, kb = jax.random.split(key)
    bound_w = 1.0 / math.sqrt(dim_in)
    # PyTorch stores (out, in); we keep (in, out) so the kernel does x @ W.
    w = jax.random.uniform(kw, (dim_in, dim_out), jnp.float32, -bound_w, bound_w)
    b = jax.random.uniform(kb, (dim_out,), jnp.float32, -bound_w, bound_w)
    return w, b


if __name__ == "__main__":
    B, DIM_IN, DIM_OUT = 8, 32, 32

    key = jax.random.PRNGKey(0)
    k_x, k_t, k_l0, k_l1 = jax.random.split(key, 4)

    x = jax.random.normal(k_x, (B, DIM_IN), jnp.float32)
    t = jax.random.uniform(k_t, (B,), jnp.float32)

    w0, b0 = init_linear_params(k_l0, DIM_IN, DIM_OUT)
    w1, b1 = init_linear_params(k_l1, DIM_IN, DIM_OUT)
    gamma = jnp.ones((DIM_OUT,), jnp.float32)   # BatchNorm1d weight init
    beta = jnp.zeros((DIM_OUT,), jnp.float32)   # BatchNorm1d bias init

    out = blend_linear(t, x, w0, b0, w1, b1, gamma, beta)
    jax.block_until_ready(out)

    # Reference 1: same math path as the kernel (bf16 operands, f32 accum).
    x_bf = x.astype(jnp.bfloat16)
    y0 = jnp.dot(x_bf, w0.astype(jnp.bfloat16),
                 preferred_element_type=jnp.float32) + b0
    yd = jnp.dot(x_bf, (w1 - w0).astype(jnp.bfloat16),
                 preferred_element_type=jnp.float32) + (b1 - b0)
    blended = y0 + yd * t[:, None]
    mean = blended.mean(axis=0, keepdims=True)
    var = ((blended - mean) ** 2).mean(axis=0, keepdims=True)
    ref_bf = (blended - mean) * jax.lax.rsqrt(var + BN_EPS) * gamma + beta
    assert jnp.allclose(out, ref_bf, atol=2e-3, rtol=2e-3), \
        "mismatch vs bf16-path reference"

    # Reference 2: original full-f32 module semantics (loose tol for bf16 matmul).
    y0f = x @ w0 + b0
    y1f = x @ w1 + b1
    bl = y0f + (y1f - y0f) * t[:, None]
    m = bl.mean(axis=0, keepdims=True)
    v = ((bl - m) ** 2).mean(axis=0, keepdims=True)
    ref_f32 = (bl - m) / jnp.sqrt(v + BN_EPS) * gamma + beta
    assert jnp.allclose(out, ref_f32, atol=5e-2, rtol=5e-2), \
        "mismatch vs f32 reference"

    print("KERNEL_OK")
</pallas_src>

<mosaic_0001>
module attributes {stable_mosaic.version = 11 : i64} {
  func.func @blend_linear_kernel(%arg0: i32, %arg1: i32, %arg2: memref<8x1xf32, #tpu.memory_space<vmem>>, %arg3: memref<8x128xbf16, #tpu.memory_space<vmem>>, %arg4: memref<128x256xbf16, #tpu.memory_space<vmem>>, %arg5: memref<1x256xf32, #tpu.memory_space<vmem>>, %arg6: memref<1x128xf32, #tpu.memory_space<vmem>>, %arg7: memref<1x128xf32, #tpu.memory_space<vmem>>, %arg8: memref<8x128xf32, #tpu.memory_space<vmem>>, %arg9: memref<8x256xf32, #tpu.memory_space<vmem>>) attributes {dimension_semantics = [#tpu.dimension_semantics<parallel>, #tpu.dimension_semantics<arbitrary>], iteration_bounds = array<i64: 1, 1>, scalar_prefetch = 0 : i64, scratch_operands = 1 : i64, tpu.core_type = #tpu.core_type<tc>, window_params = [{pipeline_mode = #tpu.pipeline_mode<synchronous>, transform_indices = @transform_0, window_bounds = array<i64: 8, 1>}, {transform_indices = @transform_1, window_bounds = array<i64: 8, 128>}, {transform_indices = @transform_2, window_bounds = array<i64: 128, 256>}, {transform_indices = @transform_3, window_bounds = array<i64: 1, 256>}, {transform_indices = @transform_4, window_bounds = array<i64: 1, 128>}, {transform_indices = @transform_5, window_bounds = array<i64: 1, 128>}, {transform_indices = @transform_6, window_bounds = array<i64: 8, 128>}]} {
    %c0_i32 = arith.constant 0 : i32
    %0 = arith.cmpi eq, %arg1, %c0_i32 : i32
    %1 = arith.extui %0 : i1 to i32
    %c0_i32_0 = arith.constant 0 : i32
    %2 = arith.cmpi ne, %1, %c0_i32_0 : i32
    scf.if %2 {
      %cst_10 = arith.constant 0.000000e+00 : f32
      %12 = vector.broadcast %cst_10 : f32 to vector<8x256xf32>
      %c0_11 = arith.constant 0 : index
      %c0_12 = arith.constant 0 : index
      %13 = vector.load %arg9[%c0_11, %c0_12] : memref<8x256xf32, #tpu.memory_space<vmem>>, vector<8x256xf32>
      tpu.vector_store %arg9[%c0_11, %c0_12], %12 {strides = array<i32>} : memref<8x256xf32, #tpu.memory_space<vmem>>, vector<8x256xf32>,
    } else {
    }
    %c0 = arith.constant 0 : index
    %c0_1 = arith.constant 0 : index
    %3 = vector.load %arg9[%c0, %c0_1] : memref<8x256xf32, #tpu.memory_space<vmem>>, vector<8x256xf32>
    %c0_2 = arith.constant 0 : index
    %c0_3 = arith.constant 0 : index
    %4 = vector.load %arg3[%c0_2, %c0_3] : memref<8x128xbf16, #tpu.memory_space<vmem>>, vector<8x128xbf16>
    %c0_4 = arith.constant 0 : index
    %c0_5 = arith.constant 0 : index
    %5 = vector.load %arg4[%c0_4, %c0_5] : memref<128x256xbf16, #tpu.memory_space<vmem>>, vector<128x256xbf16>
    %cst = arith.constant dense<0.000000e+00> : vector<8x256xf32>
    %6 = tpu.matmul %4, %5, %cst {dimension_numbers = #tpu.dot_dimension_numbers<[1], [0], [0], [1], [0, 0, 1, 1], [], []>} : vector<8x128xbf16>, vector<128x256xbf16>, vector<8x256xf32> -> vector<8x256xf32>
    %7 = arith.addf %3, %6 : vector<8x256xf32>
    %c0_6 = arith.constant 0 : index
    %c0_7 = arith.constant 0 : index
    %8 = vector.load %arg9[%c0_6, %c0_7] : memref<8x256xf32, #tpu.memory_space<vmem>>, vector<8x256xf32>
    tpu.vector_store %arg9[%c0_6, %c0_7], %7 {strides = array<i32>} : memref<8x256xf32, #tpu.memory_space<vmem>>, vector<8x256xf32>,
    %c0_i32_8 = arith.constant 0 : i32
    %9 = arith.cmpi eq, %arg1, %c0_i32_8 : i32
    %10 = arith.extui %9 : i1 to i32
    %c0_i32_9 = arith.constant 0 : i32
    %11 = arith.cmpi ne, %10, %c0_i32_9 : i32
    scf.if %11 {
      %c0_10 = arith.constant 0 : index
      %c0_11 = arith.constant 0 : index
      %12 = vector.load %arg9[%c0_10, %c0_11] : memref<8x256xf32, #tpu.memory_space<vmem>>, vector<8x256xf32>
      %c0_12 = arith.constant 0 : index
      %c0_13 = arith.constant 0 : index
      %13 = vector.load %arg5[%c0_12, %c0_13] : memref<1x256xf32, #tpu.memory_space<vmem>>, vector<1x256xf32>
      %14 = vector.broadcast %13 : vector<1x256xf32> to vector<8x256xf32>
      %15 = arith.addf %12, %14 : vector<8x256xf32>
      %16 = vector.extract_strided_slice %15 {offsets = [0, 0], sizes = [8, 128], strides = [1, 1]} : vector<8x256xf32> to vector<8x128xf32>
      %17 = vector.extract_strided_slice %15 {offsets = [0, 128], sizes = [8, 128], strides = [1, 1]} : vector<8x256xf32> to vector<8x128xf32>
      %c0_14 = arith.constant 0 : index
      %c0_15 = arith.constant 0 : index
      %18 = vector.load %arg2[%c0_14, %c0_15] : memref<8x1xf32, #tpu.memory_space<vmem>>, vector<8x1xf32>
      %19 = vector.broadcast %18 : vector<8x1xf32> to vector<8x128xf32>
      %20 = arith.mulf %17, %19 : vector<8x128xf32>
      %21 = arith.addf %16, %20 : vector<8x128xf32>
      %cst_16 = arith.constant dense<0.000000e+00> : vector<128xf32>
      %22 = vector.multi_reduction <add>, %21, %cst_16 [0] : vector<8x128xf32> to vector<128xf32>
      %23 = vector.shape_cast %22 : vector<128xf32> to vector<1x128xf32>
      %cst_17 = arith.constant 8.000000e+00 : f32
      %24 = vector.broadcast %cst_17 : f32 to vector<1x128xf32>
      %25 = arith.divf %23, %24 : vector<1x128xf32>
      %26 = vector.broadcast %25 : vector<1x128xf32> to vector<8x128xf32>
      %27 = arith.subf %21, %26 : vector<8x128xf32>
      %28 = vector.broadcast %25 : vector<1x128xf32> to vector<8x128xf32>
      %29 = arith.subf %21, %28 : vector<8x128xf32>
      %30 = arith.mulf %27, %29 : vector<8x128xf32>
      %cst_18 = arith.constant dense<0.000000e+00> : vector<128xf32>
      %31 = vector.multi_reduction <add>, %30, %cst_18 [0] : vector<8x128xf32> to vector<128xf32>
      %32 = vector.shape_cast %31 : vector<128xf32> to vector<1x128xf32>
      %cst_19 = arith.constant 8.000000e+00 : f32
      %33 = vector.broadcast %cst_19 : f32 to vector<1x128xf32>
      %34 = arith.divf %32, %33 : vector<1x128xf32>
      %cst_20 = arith.constant 9.99999974E-6 : f32
      %35 = vector.broadcast %cst_20 : f32 to vector<1x128xf32>
      %36 = arith.addf %34, %35 : vector<1x128xf32>
      %37 = math.rsqrt %36 : vector<1x128xf32>
      %38 = vector.broadcast %25 : vector<1x128xf32> to vector<8x128xf32>
      %39 = arith.subf %21, %38 : vector<8x128xf32>
      %40 = vector.broadcast %37 : vector<1x128xf32> to vector<8x128xf32>
      %41 = arith.mulf %39, %40 : vector<8x128xf32>
      %c0_21 = arith.constant 0 : index
      %c0_22 = arith.constant 0 : index
      %42 = vector.load %arg6[%c0_21, %c0_22] : memref<1x128xf32, #tpu.memory_space<vmem>>, vector<1x128xf32>
      %43 = vector.broadcast %42 : vector<1x128xf32> to vector<8x128xf32>
      %44 = arith.mulf %41, %43 : vector<8x128xf32>
      %c0_23 = arith.constant 0 : index
      %c0_24 = arith.constant 0 : index
      %45 = vector.load %arg7[%c0_23, %c0_24] : memref<1x128xf32, #tpu.memory_space<vmem>>, vector<1x128xf32>
      %46 = vector.broadcast %45 : vector<1x128xf32> to vector<8x128xf32>
      %47 = arith.addf %44, %46 : vector<8x128xf32>
      %c0_25 = arith.constant 0 : index
      %c0_26 = arith.constant 0 : index
      %48 = vector.load %arg8[%c0_25, %c0_26] : memref<8x128xf32, #tpu.memory_space<vmem>>, vector<8x128xf32>
      tpu.vector_store %arg8[%c0_25, %c0_26], %47 {strides = array<i32>} : memref<8x128xf32, #tpu.memory_space<vmem>>, vector<8x128xf32>,
    } else {
    }
    return
  }
  func.func @transform_0(%arg0: i32, %arg1: i32) -> (i32, i32) {
    %c0_i32 = arith.constant 0 : i32
    %c0_i32_0 = arith.constant 0 : i32
    %c0_i32_1 = arith.constant 0 : i32
    return %c0_i32, %c0_i32_0 : i32, i32
  }
  func.func @transform_1(%arg0: i32, %arg1: i32) -> (i32, i32) {
    %c0_i32 = arith.constant 0 : i32
    %c0_i32_0 = arith.constant 0 : i32
    return %c0_i32, %arg1 : i32, i32
  }
  func.func @transform_2(%arg0: i32, %arg1: i32) -> (i32, i32) {
    %c0_i32 = arith.constant 0 : i32
    return %arg1, %arg0 : i32, i32
  }
  func.func @transform_3(%arg0: i32, %arg1: i32) -> (i32, i32) {
    %c0_i32 = arith.constant 0 : i32
    %c0_i32_0 = arith.constant 0 : i32
    return %c0_i32, %arg0 : i32, i32
  }
  func.func @transform_4(%arg0: i32, %arg1: i32) -> (i32, i32) {
    %c0_i32 = arith.constant 0 : i32
    %c0_i32_0 = arith.constant 0 : i32
    return %c0_i32, %arg0 : i32, i32
  }
  func.func @transform_5(%arg0: i32, %arg1: i32) -> (i32, i32) {
    %c0_i32 = arith.constant 0 : i32
    %c0_i32_0 = arith.constant 0 : i32
    return %c0_i32, %arg0 : i32, i32
  }
  func.func @transform_6(%arg0: i32, %arg1: i32) -> (i32, i32) {
    %c0_i32 = arith.constant 0 : i32
    %c0_i32_0 = arith.constant 0 : i32
    return %c0_i32, %arg0 : i32, i32
  }
}

</mosaic_0001>

<bundles_post_ra>
// kernel: tpu_custom_call.1
= control target key start
LH: loop header
LB: loop body
LE: loop exit
PB: predicated region body
PF: predicated region fallthrough
CT: control target
= control target key end

     0   :  { %11 = vsyncpa [#allocation4], 0  ;;  %s445_s0 = inlined_call_operand.vmem [shape: f32[8,1], index: 0, kind: input, shape index: {}]   ;;  %s446_s1 = inlined_call_operand.vmem [shape: bf16[8,128], index: 1, kind: input, shape index: {}]   ;;  %s447_s2 = inlined_call_operand.hbm [shape: bf16[128,256], index: 2, kind: input, shape index: {}]   ;;  %s448_s3 = inlined_call_operand.vmem [shape: f32[1,256], index: 3, kind: input, shape index: {}]   ;;  %s449_s4 = inlined_call_operand.vmem [shape: f32[1,128], index: 4, kind: input, shape index: {}]   ;;  %s450_s5 = inlined_call_operand.vmem [shape: f32[1,128], index: 5, kind: input, shape index: {}]   ;;  %s451_s6 = inlined_call_operand.hbm [shape: f32[8,128], index: 6, kind: output, shape index: {}]  }
   0x1   :  { %12 = vsyncpa [#allocation5], 0  ;;  %s366_s21 = smov [#allocation3]   ;;  %s318_s25 = scalar_lea.hbm %s447_s2, 2048 }
   0x2   :  { %s22_s22 = sshll.u32 %s366_s21, 4  ;;  %p319_p0 = scmp.ne.s32.totalorder %s447_s2, %s318_s25  ;;  %s23_s22 = int_to_ptr.vmem [resolvable:$true] %s22_s22 }
   0x3   :  { %p322_p1 = scmp.lt.u32.totalorder %s318_s25, %s447_s2 }
   0x5   :  { %p324_p2 = pnand %p322_p1, %p319_p0 }
   0x7   :  { %327 = shalt.err (!%p324_p2)
}
   0x8   :  { %s328_s30 = scalar_lea.vmem %s23_s22, 2048  ;;  %p333_p4 = scmp.lt.s32.totalorder %s23_s22, %s23_s22 }
   0x9   :  { %p329_p3 = scmp.ne.s32.totalorder %s23_s22, %s328_s30  ;;  %p334_p5 = scmp.lt.s32.totalorder %s328_s30, %s328_s30 }
   0xb   :  { %p335_p6 = por %p334_p5, %p333_p4 }
   0xd   :  { %p336_p7 = pnand %p335_p6, %p329_p3 }
   0xf   :  { %339 = shalt.err (!%p336_p7)
}
  0x10   :  { %s367_s7 = smov 128   ;;  %s368_s8 = smov 8  }
  0x11   :  { %28 = dma.hbm_to_vmem [thread:$0]  %s447_s2, 2048, %s23_s22, [#allocation4], %s367_s7, %s367_s7, %s368_s8  }
  0x12   :  { %362 = dma.done.wait [#allocation4], 2048  }
  0x13   :  { %363 = vsyncadd [#allocation4], 4294965248  ;;  %v369_v0 = vmov 0   ;;  %v292_v1 = vld [vmem:[#allocation3 + $0x4] ss:$8 sps:$4 sm:$0xff]   ;;  %v196_v19 = vlaneseq  ;;  %s370_s17 = smov [#allocation6]  }
  0x14   :  { %176 = vmatprep.mubr.bf16.mxu0 %v369_v0  ;;  %291 = vset.pattern.permute.xlu0 %v369_v0  ;;  %v294_v2 = vld [vmem:[#allocation3] ss:$8 sps:$4 sm:$0xff]   ;;  %v295_v3 = vld [vmem:[#allocation3 + $0x14] ss:$8 sps:$4 sm:$0xff]   ;;  %v297_v4 = vld [vmem:[#allocation3 + $0x10] ss:$8 sps:$4 sm:$0xff]  }
  0x15   :  { %144 = vmatprep.subr.bf16.mxu0 %v292_v1  ;;  %v298_v5 = vld [vmem:[#allocation3 + $0x24] ss:$8 sps:$4 sm:$0xff]   ;;  %v300_v6 = vld [vmem:[#allocation3 + $0x20] ss:$8 sps:$4 sm:$0xff]   ;;  %v301_v7 = vld [vmem:[#allocation3 + $0x34] ss:$8 sps:$4 sm:$0xff]  }
  0x16   :  { %145 = vmatpush1.bf16.msra.mxu0 %v294_v2  ;;  %v303_v8 = vld [vmem:[#allocation3 + $0x30] ss:$8 sps:$4 sm:$0xff]   ;;  %v208_v9 = vld [vmem:[%s445_s0] sm:$0xff]  ;;  %v307_v12 = vld [vmem:[#allocation3 + $0x54] ss:$8 sps:$4 sm:$0xff]   ;;  %v197_v20 = vshrl.u32 %v196_v19, 7 }
  0x17   :  { %146 = vmatprep.subr.bf16.mxu0 %v295_v3  ;;  %v304_v10 = vld [vmem:[#allocation3 + $0x44] ss:$8 sps:$4 sm:$0xff]   ;;  %211 = vperm.xlu0 %291, %v208_v9   ;;  %v306_v11 = vld [vmem:[#allocation3 + $0x40] ss:$8 sps:$4 sm:$0xff]   ;;  %v309_v13 = vld [vmem:[#allocation3 + $0x50] ss:$8 sps:$4 sm:$0xff]  }
  0x18   :  { %v310_v14 = vld [vmem:[#allocation3 + $0x64] ss:$8 sps:$4 sm:$0xff]   ;;  %v312_v15 = vld [vmem:[#allocation3 + $0x60] ss:$8 sps:$4 sm:$0xff]   ;;  %v313_v16 = vld [vmem:[#allocation3 + $0x74] ss:$8 sps:$4 sm:$0xff]  }
  0x19   :  { %v315_v17 = vld [vmem:[#allocation3 + $0x70] ss:$8 sps:$4 sm:$0xff]   ;;  %v47_v18 = vld [vmem:[%s446_s1] sm:$0xf]  ;;  %v202_v21 = vsub.s32 1, %v197_v20  ;;  %v198_v23 = vsub.s32 0, %v197_v20 }
  0x1a   :  { %147 = vmatpush1.bf16.msra.mxu0 %v297_v4  ;;  %v194_v22 = vld [vmem:[%s448_s3] sm:$0x3]  ;;  %s259_s18 = sshll.u32 %s370_s17, 4  ;;  %s260_s18 = int_to_ptr.vmem [resolvable:$true] %s259_s18 }
  0x1b   :  { %148 = vmatprep.subr.bf16.mxu0 %v298_v5  ;;  %v203_v24 = vrot.slane %v194_v22, %v202_v21  ;;  %v199_v26 = vrot.slane %v194_v22, %v198_v23  ;;  %v284_v53 = vld [vmem:[%s449_s4] ss:$0 sm:$0xff]  ;;  %s340_s19 = scalar_lea.vmem %s260_s18, 128  ;;  %p345_p9 = scmp.lt.s32.totalorder %s260_s18, %s260_s18 }
  0x1c   :  { %v285_v55 = vld [vmem:[%s450_s5] ss:$0 sm:$0xff]  ;;  %p341_p8 = scmp.ne.s32.totalorder %s260_s18, %s340_s19  ;;  %p346_p10 = scmp.lt.s32.totalorder %s340_s19, %s340_s19 }
  0x1e   :  { %149 = vmatpush1.bf16.msra.mxu0 %v300_v6  ;;  %p347_p11 = por %p346_p10, %p345_p9 }
  0x1f   :  { %150 = vmatprep.subr.bf16.mxu0 %v301_v7 }
  0x20   :  { %p348_p12 = pnand %p347_p11, %p341_p8 }
  0x22   :  { %151 = vmatpush1.bf16.msra.mxu0 %v303_v8 }
  0x23   :  { %152 = vmatprep.subr.bf16.mxu0 %v304_v10 }
  0x26   :  { %153 = vmatpush1.bf16.msra.mxu0 %v306_v11 }
  0x27   :  { %154 = vmatprep.subr.bf16.mxu0 %v307_v12 }
  0x2a   :  { %155 = vmatpush1.bf16.msra.mxu0 %v309_v13 }
  0x2b   :  { %156 = vmatprep.subr.bf16.mxu0 %v310_v14 }
  0x2e   :  { %157 = vmatpush1.bf16.msra.mxu0 %v312_v15 }
  0x2f   :  { %158 = vmatprep.subr.bf16.mxu0 %v313_v16 }
  0x32   :  { %159 = vmatpush1.bf16.msra.mxu0 %v315_v17 }
  0x35   :  { %177 = vmatmul.mubr.bf16.vlgmr.msra.gmra.mrb[0].mxu0 %v47_v18 }
  0x96   :  { %v212_v28 = vpop.permute.xlu0 %211 }
 0x108   :  { %v178_v25 = vpop.f32.mrb[0].mxu0 }
 0x109   :  { %v180_v27 = vpop.f32.mrb[1].mxu0  ;;  %v206_v32 = vadd.f32 %v199_v26, %v178_v25 }
 0x10a   :  { %v207_v29 = vadd.f32 %v203_v24, %v180_v27  ;;  %v182_v30 = vpop.f32.mrb[2].mxu0 }
 0x10b   :  { %v183_v31 = vpop.f32.mrb[3].mxu0 }
 0x10c   :  { %v214_v33 = vmul.f32 %v212_v28, %v207_v29 }
 0x10e   :  { %v215_v34 = vadd.f32 %v214_v33, %v206_v32 }
 0x110   :  { %v216_v35 = vrot.slane %v215_v34, 4 }
 0x112   :  { %v217_v36 = vadd.f32 %v216_v35, %v215_v34 }
 0x114   :  { %v218_v37 = vrot.slane %v217_v36, 2 }
 0x116   :  { %v219_v38 = vadd.f32 %v218_v37, %v217_v36 }
 0x118   :  { %v220_v39 = vrot.slane %v219_v38, 1 }
 0x11a   :  { %v221_v40 = vadd.f32 %v220_v39, %v219_v38 }
 0x11c   :  { %v223_v41 = vmul.f32 0.125, %v221_v40 }
 0x11e   :  { %v224_v42 = vsub.f32 %v215_v34, %v223_v41 }
 0x120   :  { %v225_v43 = vmul.f32 %v224_v42, %v224_v42 }
 0x122   :  { %v226_v44 = vrot.slane %v225_v43, 4 }
 0x124   :  { %v227_v45 = vadd.f32 %v226_v44, %v225_v43 }
 0x126   :  { %v228_v46 = vrot.slane %v227_v45, 2 }
 0x128   :  { %v229_v47 = vadd.f32 %v228_v46, %v227_v45 }
 0x12a   :  { %v230_v48 = vrot.slane %v229_v47, 1 }
 0x12c   :  { %v231_v49 = vadd.f32 %v230_v48, %v229_v47 }
 0x12e   :  { %v232_v50 = vmul.f32 0.125, %v231_v49 }
 0x130   :  { %v233_v51 = vadd.f32 1e-05, %v232_v50 }
 0x132   :  { %316 = vrsqrt.f32 %v233_v51 }
 0x13c   :  { %v317_v52 = vpop.eup %316 }
 0x13d   :  { %v235_v54 = vmul.f32 %v317_v52, %v224_v42 }
 0x13f   :  { %v243_v56 = vmul.f32 %v284_v53, %v235_v54 }
 0x141   :  { %v251_v57 = vadd.f32 %v285_v55, %v243_v56 }
 0x143   :  { %252 = vst [vmem:[#allocation6] sm:$0xff] %v251_v57 }
 0x144   :  { %351 = shalt.err (!%p348_p12)
}
 0x145   :  { %s352_s21 = scalar_lea.hbm %s451_s6, 128 }
 0x146   :  { %p353_p13 = scmp.ne.s32.totalorder %s451_s6, %s352_s21  ;;  %p356_p0 = scmp.lt.u32.totalorder %s352_s21, %s451_s6 }
 0x148   :  { %p358_p1 = pnand %p356_p0, %p353_p13 }
 0x14a   :  { %361 = shalt.err (!%p358_p1)
}
 0x14b   :  { %262 = dma.vmem_to_hbm [thread:$0]  %s260_s18, 128, %s451_s6, [#allocation5]  }
 0x14c   :  { %364 = dma.done.wait [#allocation5], 128  }
 0x14d   :  { %365 = vsyncadd [#allocation5], 4294967168 }
 0x14e   :  { %266 = vsyncpa [#allocation4], 1 }
 0x14f   :  { %267 = vsyncpa [#allocation5], 1 }

</bundles_post_ra>
